<compile_context>
chip_gen: v5e
topology: v5e:2x2
jax: 0.10.0
libtpu: 0.0.40
codegen_flags: <defaults>
</compile_context>

<pallas_src>
import functools
import math

import jax
import jax.numpy as jnp
from jax.experimental import pallas as pl
from jax.experimental.pallas import tpu as pltpu


_VMEM_LIMIT = 64 * 1024 * 1024


def _round_up(x, m):
    return ((x + m - 1) // m) * m


def _choose_k(K):
    """Return (padded K, k-tile).  Prefer full-extent blocks to avoid pad copies."""
    if K % 128 == 0:
        for tk in (2048, 1536, 1280, 1024, 768, 640, 512, 384, 256, 128):
            if K % tk == 0:
                return K, tk
    if K <= 4096:
        return K, K                      # full extent: legal block, no pad, no dead FLOPs
    Kp = _round_up(K, 512)
    return Kp, 512


def _choose_n(N):
    if N <= 1024:
        return N, N                      # full extent (handles 320 / 960 / 4 without pad)
    for tn in (1024, 640, 512, 384, 256, 128):
        if N % tn == 0:
            return N, tn
    Np = _round_up(N, 256)
    return Np, 256


def _choose_rows(M, cap=512):
    tm = min(cap, _round_up(M, 8))
    return _round_up(M, tm), tm


def _row_tile(R):
    for t in (512, 256, 128, 64, 32, 16, 8):
        if R % t == 0:
            return t
    return R


def _seq_tile(L):
    if L % 256 == 0:
        return 256
    if L % 128 == 0:
        return 128
    return _round_up(L, 8)


# ----------------------------- matmul (bias / SiLU / residual fused) -----------------------------

def _matmul_kernel(*refs, activation, has_add):
    if has_add:
        a_ref, b_ref, bias_ref, add_ref, o_ref, acc_ref = refs
    else:
        a_ref, b_ref, bias_ref, o_ref, acc_ref = refs
        add_ref = None
    k = pl.program_id(2)

    @pl.when(k == 0)
    def _():
        acc_ref[...] = jnp.zeros_like(acc_ref)

    acc_ref[...] += jnp.dot(a_ref[...], b_ref[...],
                            preferred_element_type=jnp.float32)

    @pl.when(k == pl.num_programs(2) - 1)
    def _():
        out = acc_ref[...] + bias_ref[...]
        if activation == "silu":
            out = out * pl.reciprocal(1.0 + jnp.exp(-out), approx=True)
        if has_add:
            out = out + add_ref[...].astype(jnp.float32)
        o_ref[...] = out.astype(o_ref.dtype)


def matmul(x, w, b=None, add=None, activation="none", out_dtype=jnp.bfloat16):
    """act(x @ w + b) (+ add).  bf16 MXU operands, f32 accumulation, fused epilogue."""
    M, K = x.shape
    K2, N = w.shape
    assert K == K2
    x = x.astype(jnp.bfloat16)
    w = w.astype(jnp.bfloat16)
    bias = jnp.zeros((N,), jnp.float32) if b is None else b.astype(jnp.float32)
    bias = bias.reshape(1, N)

    Mp, tm = _choose_rows(M)
    Kp, tk = _choose_k(K)
    Np, tn = _choose_n(N)

    if (Mp, Kp) != (M, K):
        x = jnp.pad(x, ((0, Mp - M), (0, Kp - K)))
    if (Kp, Np) != (K, N):
        w = jnp.pad(w, ((0, Kp - K), (0, Np - N)))
    if Np != N:
        bias = jnp.pad(bias, ((0, 0), (0, Np - N)))

    has_add = add is not None
    operands = [x, w, bias]
    in_specs = [
        pl.BlockSpec((tm, tk), lambda i, j, k: (i, k)),
        pl.BlockSpec((tk, tn), lambda i, j, k: (k, j)),
        pl.BlockSpec((1, tn), lambda i, j, k: (0, j)),
    ]
    if has_add:
        add = add.astype(jnp.bfloat16)
        if (Mp, Np) != (M, N):
            add = jnp.pad(add, ((0, Mp - M), (0, Np - N)))
        operands.append(add)
        in_specs.append(pl.BlockSpec((tm, tn), lambda i, j, k: (i, j)))

    out = pl.pallas_call(
        functools.partial(_matmul_kernel, activation=activation, has_add=has_add),
        out_shape=jax.ShapeDtypeStruct((Mp, Np), out_dtype),
        grid=(Mp // tm, Np // tn, Kp // tk),
        in_specs=in_specs,
        out_specs=pl.BlockSpec((tm, tn), lambda i, j, k: (i, j)),
        scratch_shapes=[pltpu.VMEM((tm, tn), jnp.float32)],
        compiler_params=pltpu.CompilerParams(
            dimension_semantics=("parallel", "parallel", "arbitrary"),
            vmem_limit_bytes=_VMEM_LIMIT),
    )(*operands)
    if (Mp, Np) != (M, N):
        out = out[:M, :N]
    return out


# ----------------------------- fused GEGLU matmul -----------------------------

def _geglu_mm_kernel(x_ref, wa_ref, wg_ref, ba_ref, bg_ref, o_ref, acc_a, acc_g):
    k = pl.program_id(2)

    @pl.when(k == 0)
    def _():
        acc_a[...] = jnp.zeros_like(acc_a)
        acc_g[...] = jnp.zeros_like(acc_g)

    xv = x_ref[...]
    acc_a[...] += jnp.dot(xv, wa_ref[...], preferred_element_type=jnp.float32)
    acc_g[...] += jnp.dot(xv, wg_ref[...], preferred_element_type=jnp.float32)

    @pl.when(k == pl.num_programs(2) - 1)
    def _():
        a = acc_a[...] + ba_ref[...]
        g = acc_g[...] + bg_ref[...]
        # TODO(synk): F.gelu default is exact (erf-based); erf is not reliably lowered by
        # Mosaic, so the tanh approximation is used inside the kernel.
        c = 0.7978845608028654
        gelu = 0.5 * g * (1.0 + jnp.tanh(c * (g + 0.044715 * g * g * g)))
        o_ref[...] = (a * gelu).astype(o_ref.dtype)


def matmul_geglu(x, wa, ba, wg, bg):
    """(x @ wa + ba) * gelu(x @ wg + bg); the 8C intermediate never hits HBM."""
    M, K = x.shape
    N = wa.shape[1]
    x = x.astype(jnp.bfloat16)
    wa = wa.astype(jnp.bfloat16)
    wg = wg.astype(jnp.bfloat16)
    ba = ba.astype(jnp.float32).reshape(1, N)
    bg = bg.astype(jnp.float32).reshape(1, N)

    Mp, tm = _choose_rows(M)
    Kp, tk = _choose_k(K)
    Np, tn = _choose_n(N)
    if (Mp, Kp) != (M, K):
        x = jnp.pad(x, ((0, Mp - M), (0, Kp - K)))
    if (Kp, Np) != (K, N):
        wa = jnp.pad(wa, ((0, Kp - K), (0, Np - N)))
        wg = jnp.pad(wg, ((0, Kp - K), (0, Np - N)))
    if Np != N:
        ba = jnp.pad(ba, ((0, 0), (0, Np - N)))
        bg = jnp.pad(bg, ((0, 0), (0, Np - N)))

    out = pl.pallas_call(
        _geglu_mm_kernel,
        out_shape=jax.ShapeDtypeStruct((Mp, Np), jnp.bfloat16),
        grid=(Mp // tm, Np // tn, Kp // tk),
        in_specs=[
            pl.BlockSpec((tm, tk), lambda i, j, k: (i, k)),
            pl.BlockSpec((tk, tn), lambda i, j, k: (k, j)),
            pl.BlockSpec((tk, tn), lambda i, j, k: (k, j)),
            pl.BlockSpec((1, tn), lambda i, j, k: (0, j)),
            pl.BlockSpec((1, tn), lambda i, j, k: (0, j)),
        ],
        out_specs=pl.BlockSpec((tm, tn), lambda i, j, k: (i, j)),
        scratch_shapes=[pltpu.VMEM((tm, tn), jnp.float32),
                        pltpu.VMEM((tm, tn), jnp.float32)],
        compiler_params=pltpu.CompilerParams(
            dimension_semantics=("parallel", "parallel", "arbitrary"),
            vmem_limit_bytes=_VMEM_LIMIT),
    )(x, wa, wg, ba, bg)
    if (Mp, Np) != (M, N):
        out = out[:M, :N]
    return out


# ----------------------------- norms -----------------------------

def _layernorm_kernel(x_ref, g_ref, b_ref, o_ref, *, eps):
    x = x_ref[...].astype(jnp.float32)
    mean = jnp.mean(x, axis=-1, keepdims=True)
    cent = x - mean
    var = jnp.mean(cent * cent, axis=-1, keepdims=True)
    y = cent * jax.lax.rsqrt(var + eps)
    y = y * g_ref[...] + b_ref[...]
    o_ref[...] = y.astype(o_ref.dtype)


def layer_norm(x2d, p, eps=1e-5):
    R, C = x2d.shape
    tr = _row_tile(R)
    return pl.pallas_call(
        functools.partial(_layernorm_kernel, eps=eps),
        out_shape=jax.ShapeDtypeStruct((R, C), x2d.dtype),
        grid=(R // tr,),
        in_specs=[pl.BlockSpec((tr, C), lambda i: (i, 0)),
                  pl.BlockSpec((1, C), lambda i: (0, 0)),
                  pl.BlockSpec((1, C), lambda i: (0, 0))],
        out_specs=pl.BlockSpec((tr, C), lambda i: (i, 0)),
        compiler_params=pltpu.CompilerParams(
            dimension_semantics=("parallel",)),
    )(x2d, p["g"].reshape(1, C), p["b"].reshape(1, C))


def _groupnorm_kernel(x_ref, g_ref, b_ref, m_ref, o_ref, *, eps, apply_silu, inv_n):
    x = x_ref[0].astype(jnp.float32)                 # (HW, C)
    m = m_ref[...]                                   # (C, G) 0/1 group membership
    s1 = jnp.sum(x, axis=0, keepdims=True)           # (1, C)
    gsum = jax.lax.dot_general(s1, m, (((1,), (0,)), ((), ())),
                               preferred_element_type=jnp.float32)       # (1, G)
    gmean = gsum * inv_n
    mean_c = jax.lax.dot_general(gmean, m, (((1,), (1,)), ((), ())),
                                 preferred_element_type=jnp.float32)     # (1, C)
    cent = x - mean_c
    s2 = jnp.sum(cent * cent, axis=0, keepdims=True)                     # (1, C)
    gvar = jax.lax.dot_general(s2, m, (((1,), (0,)), ((), ())),
                               preferred_element_type=jnp.float32) * inv_n
    rstd = jax.lax.rsqrt(gvar + eps)                                      # (1, G)
    rstd_c = jax.lax.dot_general(rstd, m, (((1,), (1,)), ((), ())),
                                 preferred_element_type=jnp.float32)     # (1, C)
    y = cent * rstd_c * g_ref[...] + b_ref[...]
    if apply_silu:
        y = y * pl.reciprocal(1.0 + jnp.exp(-y), approx=True)
    o_ref[0] = y.astype(o_ref.dtype)


def _group_membership(C, G):
    cg = C // G
    ch = jnp.arange(C) // cg
    return (ch[:, None] == jnp.arange(G)[None, :]).astype(jnp.float32)


def group_norm(x, p, *, eps=1e-5, apply_silu=False, num_groups=32):
    """GroupNorm on NHWC activations; stats via tiny membership-matrix dots (no broadcasts)."""
    B, H, W, C = x.shape
    HW = H * W
    G = num_groups
    member = _group_membership(C, G)
    xr = x.reshape(B, HW, C)
    out = pl.pallas_call(
        functools.partial(_groupnorm_kernel, eps=eps, apply_silu=apply_silu,
                          inv_n=1.0 / float(HW * (C // G))),
        out_shape=jax.ShapeDtypeStruct((B, HW, C), x.dtype),
        grid=(B,),
        in_specs=[pl.BlockSpec((1, HW, C), lambda b: (b, 0, 0)),
                  pl.BlockSpec((1, C), lambda b: (0, 0)),
                  pl.BlockSpec((1, C), lambda b: (0, 0)),
                  pl.BlockSpec((C, G), lambda b: (0, 0))],
        out_specs=pl.BlockSpec((1, HW, C), lambda b: (b, 0, 0)),
        compiler_params=pltpu.CompilerParams(
            dimension_semantics=("parallel",),
            vmem_limit_bytes=_VMEM_LIMIT),
    )(xr, p["g"].reshape(1, C), p["b"].reshape(1, C), member)
    return out.reshape(B, H, W, C)


# ----------------------------- small elementwise -----------------------------

def _silu_kernel(x_ref, o_ref):
    x = x_ref[...].astype(jnp.float32)
    o_ref[...] = (x * pl.reciprocal(1.0 + jnp.exp(-x), approx=True)).astype(o_ref.dtype)


def pallas_silu(x):
    return pl.pallas_call(
        _silu_kernel, out_shape=jax.ShapeDtypeStruct(x.shape, x.dtype))(x)


# ----------------------------- flash attention -----------------------------

def _flash_kernel(q_ref, k_ref, v_ref, o_ref, m_sc, l_sc, acc_sc,
                  *, scale, kv_len, kv_tile, masked):
    ki = pl.program_id(2)

    @pl.when(ki == 0)
    def _():
        m_sc[...] = jnp.full(m_sc.shape, -1e30, jnp.float32)
        l_sc[...] = jnp.zeros_like(l_sc)
        acc_sc[...] = jnp.zeros_like(acc_sc)

    s = jnp.einsum("hqd,hkd->hqk", q_ref[...], k_ref[...],
                   preferred_element_type=jnp.float32) * scale
    if masked:
        col = ki * kv_tile + jax.lax.broadcasted_iota(jnp.int32, s.shape, 2)
        s = jnp.where(col < kv_len, s, -1e30)

    m_prev = m_sc[...]
    m_new = jnp.maximum(m_prev, jnp.max(s, axis=-1, keepdims=True))
    alpha = jnp.exp(m_prev - m_new)
    p = jnp.exp(s - m_new)
    l_sc[...] = alpha * l_sc[...] + jnp.sum(p, axis=-1, keepdims=True)
    acc_sc[...] = alpha * acc_sc[...] + jnp.einsum(
        "hqk,hkd->hqd", p.astype(v_ref.dtype), v_ref[...],
        preferred_element_type=jnp.float32)
    m_sc[...] = m_new

    @pl.when(ki == pl.num_programs(2) - 1)
    def _():
        o_ref[...] = (acc_sc[...] *
                      pl.reciprocal(l_sc[...], approx=True)).astype(o_ref.dtype)


def attention(q, k, v, n_heads):
    """q:(B,T,C) k,v:(B,S,C) -> (B,T,C); flash-style online-softmax, heads batched."""
    B, T, C = q.shape
    S = k.shape[1]
    D = C // n_heads
    scale = 1.0 / math.sqrt(D)
    Dp = _round_up(D, 128)
    BH = B * n_heads

    def heads(x, L):
        return x.reshape(B, L, n_heads, D).transpose(0, 2, 1, 3).reshape(BH, L, D)

    qh, kh, vh = heads(q, T), heads(k, S), heads(v, S)
    tq = _seq_tile(T)
    tkv = _seq_tile(S)
    Tp = _round_up(T, tq)
    Sp = _round_up(S, tkv)
    qh = jnp.pad(qh.astype(jnp.bfloat16), ((0, 0), (0, Tp - T), (0, Dp - D)))
    kh = jnp.pad(kh.astype(jnp.bfloat16), ((0, 0), (0, Sp - S), (0, Dp - D)))
    vh = jnp.pad(vh.astype(jnp.bfloat16), ((0, 0), (0, Sp - S), (0, Dp - D)))

    Hb = 1
    for h in (8, 4, 2):
        if BH % h == 0:
            Hb = h
            break

    out = pl.pallas_call(
        functools.partial(_flash_kernel, scale=scale, kv_len=S, kv_tile=tkv,
                          masked=(Sp != S)),
        out_shape=jax.ShapeDtypeStruct((BH, Tp, Dp), jnp.bfloat16),
        grid=(BH // Hb, Tp // tq, Sp // tkv),
        in_specs=[
            pl.BlockSpec((Hb, tq, Dp), lambda g, qi, ki: (g, qi, 0)),
            pl.BlockSpec((Hb, tkv, Dp), lambda g, qi, ki: (g, ki, 0)),
            pl.BlockSpec((Hb, tkv, Dp), lambda g, qi, ki: (g, ki, 0)),
        ],
        out_specs=pl.BlockSpec((Hb, tq, Dp), lambda g, qi, ki: (g, qi, 0)),
        scratch_shapes=[pltpu.VMEM((Hb, tq, 1), jnp.float32),
                        pltpu.VMEM((Hb, tq, 1), jnp.float32),
                        pltpu.VMEM((Hb, tq, Dp), jnp.float32)],
        compiler_params=pltpu.CompilerParams(
            dimension_semantics=("parallel", "parallel", "arbitrary"),
            vmem_limit_bytes=_VMEM_LIMIT),
    )(qh, kh, vh)

    out = out[:, :T, :D].reshape(B, n_heads, T, D).transpose(0, 2, 1, 3).reshape(B, T, C)
    return out


# ----------------------------- module wrappers (NHWC, bf16) -----------------------------

def conv2d(x, p, stride=1, add=None, bias=None):
    """x: NHWC bf16; p['w']: (k*k*Cin, Cout) im2col layout; optional fused residual `add`."""
    # TODO(synk): im2col is still materialized in HBM (fusing the patch gather into the
    # matmul via element-offset index maps is left out for robustness).
    k = p["k"]
    pad = (k - 1) // 2
    B, H, W, C = x.shape
    cout = p["w"].shape[1]
    b = p["b"] if bias is None else bias
    if k == 1 and stride == 1:
        cols = x.reshape(B * H * W, C)
        Ho, Wo = H, W
    else:
        xp = jnp.pad(x, ((0, 0), (pad, pad), (pad, pad), (0, 0)))
        Ho = (H + 2 * pad - k) // stride + 1
        Wo = (W + 2 * pad - k) // stride + 1
        patches = []
        for dh in range(k):
            for dw in range(k):
                patches.append(xp[:, dh:dh + stride * (Ho - 1) + 1:stride,
                                  dw:dw + stride * (Wo - 1) + 1:stride, :])
        cols = jnp.concatenate(patches, axis=-1).reshape(B * Ho * Wo, k * k * C)
    y = matmul(cols, p["w"], b, add=add)
    return y.reshape(B, Ho, Wo, cout)


def res_block(x, t_silu, p):
    B, H, W, C = x.shape
    h = group_norm(x, p["gn1"], eps=1e-5, apply_silu=True)
    # time projection folded into conv1's bias (time has batch 1 -> pure per-channel shift)
    tproj = matmul(t_silu, p["lt"]["w"], p["lt"]["b"], out_dtype=jnp.float32)   # (1, Cout)
    bias_eff = p["conv1"]["b"] + tproj.reshape(-1)
    h = conv2d(h, p["conv1"], bias=bias_eff)
    h = group_norm(h, p["gn2"], eps=1e-5, apply_silu=True)
    if p["skip"] is None:
        skip = x.reshape(B * H * W, C)
    else:
        skip = matmul(x.reshape(B * H * W, C), p["skip"]["w"], p["skip"]["b"])
    return conv2d(h, p["conv2"], add=skip)          # residual fused into conv2 epilogue


def attention_block(x, context, p):
    B, H, W, C = x.shape
    T = H * W
    nh = p["heads"]
    S, d_ctx = context.shape[1], context.shape[2]
    res_long = x.reshape(B * T, C)

    h = group_norm(x, p["gn"], eps=1e-6)
    h = matmul(h.reshape(B * T, C), p["conv_in"]["w"], p["conv_in"]["b"])   # 1x1 conv

    # self attention (fused QKV projection: x read once, one kernel launch)
    res = h
    hn = layer_norm(h, p["ln1"])
    qkv = matmul(hn, p["a1_qkv"]["w"])                                      # (BT, 3C)
    q = qkv[:, :C]
    k = qkv[:, C:2 * C]
    v = qkv[:, 2 * C:]
    a = attention(q.reshape(B, T, C), k.reshape(B, T, C), v.reshape(B, T, C), nh)
    h = matmul(a.reshape(B * T, C), p["a1_out"]["w"], p["a1_out"]["b"], add=res)

    # cross attention (fused KV projection from context)
    res = h
    hn = layer_norm(h, p["ln2"])
    q = matmul(hn, p["a2_q"]["w"])
    ctx2 = context.reshape(B * S, d_ctx)
    kv = matmul(ctx2, p["a2_kv"]["w"])                                      # (BS, 2C)
    ck = kv[:, :C]
    cv = kv[:, C:]
    a = attention(q.reshape(B, T, C), ck.reshape(B, S, C), cv.reshape(B, S, C), nh)
    h = matmul(a.reshape(B * T, C), p["a2_out"]["w"], p["a2_out"]["b"], add=res)

    # GEGLU feed-forward (fused; 8C intermediate stays in VMEM)
    res = h
    hn = layer_norm(h, p["ln3"])
    hg = matmul_geglu(hn, p["geglu_a"]["w"], p["geglu_a"]["b"],
                      p["geglu_g"]["w"], p["geglu_g"]["b"])
    h = matmul(hg, p["geglu2"]["w"], p["geglu2"]["b"], add=res)

    # 1x1 output conv fused with the long residual
    out = matmul(h, p["conv_out"]["w"], p["conv_out"]["b"], add=res_long)
    return out.reshape(B, H, W, C)


def switch_sequential(layers, x, context, t_silu):
    for kind, p in layers:
        if kind == "res":
            x = res_block(x, t_silu, p)
        elif kind == "attn":
            x = attention_block(x, context, p)
        elif kind == "conv":
            x = conv2d(x, p["p"], stride=p["stride"])
        elif kind == "up":
            x = jnp.repeat(jnp.repeat(x, 2, axis=1), 2, axis=2)   # nearest 2x, NHWC
            x = conv2d(x, p)
    return x


def unet_forward(up, x, context, t_silu):
    skips = []
    for layers in up["encoders"]:
        x = switch_sequential(layers, x, context, t_silu)
        skips.append(x)
    x = switch_sequential(up["bottleneck"], x, context, t_silu)
    for layers in up["decoders"]:
        x = jnp.concatenate([x, skips.pop()], axis=-1)
        x = switch_sequential(layers, x, context, t_silu)
    return x


def diffusion_forward(params, latent, context, time):
    t = matmul(time, params["time"]["l1"]["w"], params["time"]["l1"]["b"],
               activation="silu", out_dtype=jnp.float32)           # Linear+SiLU fused
    t = matmul(t, params["time"]["l2"]["w"], params["time"]["l2"]["b"],
               out_dtype=jnp.float32)                               # (1, 1280)
    t_silu = pallas_silu(t)        # silu(time) shared by every residual block

    x = jnp.transpose(latent, (0, 2, 3, 1)).astype(jnp.bfloat16)    # NCHW -> NHWC
    ctx = context.astype(jnp.bfloat16)
    x = unet_forward(params["unet"], x, ctx, t_silu)
    x = group_norm(x, params["final"]["gn"], eps=1e-5, apply_silu=True)
    x = conv2d(x, params["final"]["conv"])
    return jnp.transpose(x, (0, 3, 1, 2)).astype(jnp.float32)       # back to NCHW f32


# ----------------------------- parameter init -----------------------------

class _Init:
    def __init__(self, seed):
        self.key = jax.random.PRNGKey(seed)

    def _take(self):
        self.key, k = jax.random.split(self.key)
        return k

    def dense(self, din, dout, bias=True):
        w = (jax.random.normal(self._take(), (din, dout), jnp.float32) /
             math.sqrt(din)).astype(jnp.bfloat16)
        b = jnp.zeros((dout,), jnp.float32) if bias else None
        return {"w": w, "b": b}

    def conv(self, cin, cout, k):
        # stored directly in im2col layout (k*k*cin, cout)
        w = (jax.random.normal(self._take(), (k * k * cin, cout), jnp.float32) /
             math.sqrt(k * k * cin)).astype(jnp.bfloat16)
        return {"w": w, "b": jnp.zeros((cout,), jnp.float32), "k": k}

    def norm(self, c):
        return {"g": jnp.ones((c,), jnp.float32), "b": jnp.zeros((c,), jnp.float32)}


def _res_params(init, cin, cout, n_time=1280):
    return {"gn1": init.norm(cin), "conv1": init.conv(cin, cout, 3),
            "lt": init.dense(n_time, cout), "gn2": init.norm(cout),
            "conv2": init.conv(cout, cout, 3),
            "skip": None if cin == cout else init.conv(cin, cout, 1)}


def _attn_params(init, n_heads, d_embed, d_ctx=768):
    c = n_heads * d_embed
    return {"gn": init.norm(c), "conv_in": init.conv(c, c, 1),
            "ln1": init.norm(c),
            "a1_qkv": init.dense(c, 3 * c, bias=False),      # fused self-attn q/k/v
            "a1_out": init.dense(c, c),
            "ln2": init.norm(c),
            "a2_q": init.dense(c, c, bias=False),
            "a2_kv": init.dense(d_ctx, 2 * c, bias=False),   # fused cross-attn k/v
            "a2_out": init.dense(c, c),
            "ln3": init.norm(c),
            "geglu_a": init.dense(c, 4 * c), "geglu_g": init.dense(c, 4 * c),
            "geglu2": init.dense(4 * c, c),
            "conv_out": init.conv(c, c, 1), "heads": n_heads}


def build_params(seed=42):
    init = _Init(seed)
    enc = [
        [("conv", (4, 320, 1))],
        [("res", (320, 320)), ("attn", (8, 40))],
        [("res", (320, 320)), ("attn", (8, 40))],
        [("conv", (320, 320, 2))],
        [("res", (320, 640)), ("attn", (8, 80))],
        [("res", (640, 640)), ("attn", (8, 80))],
        [("conv", (640, 640, 2))],
        [("res", (640, 1280)), ("attn", (8, 160))],
        [("res", (1280, 1280)), ("attn", (8, 160))],
        [("conv", (1280, 1280, 2))],
        [("res", (1280, 1280))],
        [("res", (1280, 1280))],
    ]
    bott = [("res", (1280, 1280)), ("attn", (8, 160)), ("res", (1280, 1280))]
    dec = [
        [("res", (2560, 1280))],
        [("res", (2560, 1280))],
        [("res", (2560, 1280)), ("up", (1280,))],
        [("res", (2560, 1280)), ("attn", (8, 160))],
        [("res", (2560, 1280)), ("attn", (8, 160))],
        [("res", (1920, 1280)), ("attn", (8, 160)), ("up", (1280,))],
        [("res", (1920, 640)), ("attn", (8, 80))],
        [("res", (1280, 640)), ("attn", (8, 80))],
        [("res", (960, 640)), ("attn", (8, 80)), ("up", (640,))],
        [("res", (960, 320)), ("attn", (8, 40))],
        [("res", (640, 320)), ("attn", (8, 40))],
        [("res", (640, 320)), ("attn", (8, 40))],
    ]

    def make(kind, args):
        if kind == "conv":
            cin, cout, stride = args
            return ("conv", {"p": init.conv(cin, cout, 3), "stride": stride})
        if kind == "res":
            return ("res", _res_params(init, *args))
        if kind == "attn":
            return ("attn", _attn_params(init, *args))
        if kind == "up":
            (c,) = args
            return ("up", init.conv(c, c, 3))

    return {
        "time": {"l1": init.dense(320, 1280), "l2": init.dense(1280, 1280)},
        "unet": {
            "encoders": [[make(k, a) for k, a in blk] for blk in enc],
            "bottleneck": [make(k, a) for k, a in bott],
            "decoders": [[make(k, a) for k, a in blk] for blk in dec],
        },
        "final": {"gn": init.norm(320), "conv": init.conv(320, 4, 3)},
    }


# ----------------------------- main -----------------------------

if __name__ == "__main__":
    key = jax.random.PRNGKey(0)
    k1, k2, k3 = jax.random.split(key, 3)
    B, H, W = 2, 16, 16          # spatial must be divisible by 8 (3 stride-2 downsamples)
    S_CTX = 8                    # small context sequence length
    latent = jax.random.normal(k1, (B, 4, H, W), jnp.float32)
    context = jax.random.normal(k2, (B, S_CTX, 768), jnp.float32)
    time = jax.random.normal(k3, (1, 320), jnp.float32)

    params = build_params(seed=42)
    out = diffusion_forward(params, latent, context, time)
    out = jax.block_until_ready(out)

    assert out.shape == (B, 4, H, W), out.shape
    assert bool(jnp.all(jnp.isfinite(out)))
    print("KERNEL_OK")
</pallas_src>

<mosaic_0001>
module attributes {stable_mosaic.version = 11 : i64} {
  func.func @_matmul_kernel(%arg0: i32, %arg1: i32, %arg2: i32, %arg3: memref<8x320xbf16, #tpu.memory_space<vmem>>, %arg4: memref<320x640xbf16, #tpu.memory_space<vmem>>, %arg5: memref<1x640xf32, #tpu.memory_space<vmem>>, %arg6: memref<8x640xf32, #tpu.memory_space<vmem>>, %arg7: memref<8x640xf32, #tpu.memory_space<vmem>>) attributes {dimension_semantics = [#tpu.dimension_semantics<parallel>, #tpu.dimension_semantics<parallel>, #tpu.dimension_semantics<arbitrary>], iteration_bounds = array<i64: 1, 2, 1>, scalar_prefetch = 0 : i64, scratch_operands = 1 : i64, tpu.core_type = #tpu.core_type<tc>, window_params = [{transform_indices = @transform_0, window_bounds = array<i64: 8, 320>}, {transform_indices = @transform_1, window_bounds = array<i64: 320, 640>}, {transform_indices = @transform_2, window_bounds = array<i64: 1, 640>}, {transform_indices = @transform_3, window_bounds = array<i64: 8, 640>}]} {
    %c0_i32 = arith.constant 0 : i32
    %0 = arith.cmpi eq, %arg2, %c0_i32 : i32
    %1 = arith.extui %0 : i1 to i32
    %c0_i32_0 = arith.constant 0 : i32
    %2 = arith.cmpi ne, %1, %c0_i32_0 : i32
    scf.if %2 {
      %cst_10 = arith.constant 0.000000e+00 : f32
      %12 = vector.broadcast %cst_10 : f32 to vector<8x640xf32>
      %c0_11 = arith.constant 0 : index
      %c0_12 = arith.constant 0 : index
      %13 = vector.load %arg7[%c0_11, %c0_12] : memref<8x640xf32, #tpu.memory_space<vmem>>, vector<8x640xf32>
      tpu.vector_store %arg7[%c0_11, %c0_12], %12 {strides = array<i32>} : memref<8x640xf32, #tpu.memory_space<vmem>>, vector<8x640xf32>,
    } else {
    }
    %c0 = arith.constant 0 : index
    %c0_1 = arith.constant 0 : index
    %3 = vector.load %arg7[%c0, %c0_1] : memref<8x640xf32, #tpu.memory_space<vmem>>, vector<8x640xf32>
    %c0_2 = arith.constant 0 : index
    %c0_3 = arith.constant 0 : index
    %4 = vector.load %arg3[%c0_2, %c0_3] : memref<8x320xbf16, #tpu.memory_space<vmem>>, vector<8x320xbf16>
    %c0_4 = arith.constant 0 : index
    %c0_5 = arith.constant 0 : index
    %5 = vector.load %arg4[%c0_4, %c0_5] : memref<320x640xbf16, #tpu.memory_space<vmem>>, vector<320x640xbf16>
    %cst = arith.constant dense<0.000000e+00> : vector<8x640xf32>
    %6 = tpu.matmul %4, %5, %cst {dimension_numbers = #tpu.dot_dimension_numbers<[1], [0], [0], [1], [0, 0, 1, 1], [], []>} : vector<8x320xbf16>, vector<320x640xbf16>, vector<8x640xf32> -> vector<8x640xf32>
    %7 = arith.addf %3, %6 : vector<8x640xf32>
    %c0_6 = arith.constant 0 : index
    %c0_7 = arith.constant 0 : index
    %8 = vector.load %arg7[%c0_6, %c0_7] : memref<8x640xf32, #tpu.memory_space<vmem>>, vector<8x640xf32>
    tpu.vector_store %arg7[%c0_6, %c0_7], %7 {strides = array<i32>} : memref<8x640xf32, #tpu.memory_space<vmem>>, vector<8x640xf32>,
    %c0_i32_8 = arith.constant 0 : i32
    %9 = arith.cmpi eq, %arg2, %c0_i32_8 : i32
    %10 = arith.extui %9 : i1 to i32
    %c0_i32_9 = arith.constant 0 : i32
    %11 = arith.cmpi ne, %10, %c0_i32_9 : i32
    scf.if %11 {
      %c0_10 = arith.constant 0 : index
      %c0_11 = arith.constant 0 : index
      %12 = vector.load %arg7[%c0_10, %c0_11] : memref<8x640xf32, #tpu.memory_space<vmem>>, vector<8x640xf32>
      %c0_12 = arith.constant 0 : index
      %c0_13 = arith.constant 0 : index
      %13 = vector.load %arg5[%c0_12, %c0_13] : memref<1x640xf32, #tpu.memory_space<vmem>>, vector<1x640xf32>
      %14 = vector.broadcast %13 : vector<1x640xf32> to vector<8x640xf32>
      %15 = arith.addf %12, %14 : vector<8x640xf32>
      %cst_14 = arith.constant 0.000000e+00 : f32
      %16 = vector.broadcast %cst_14 : f32 to vector<8x640xf32>
      %17 = arith.subf %16, %15 : vector<8x640xf32>
      %18 = math.exp %17 : vector<8x640xf32>
      %cst_15 = arith.constant 1.000000e+00 : f32
      %19 = vector.broadcast %cst_15 : f32 to vector<8x640xf32>
      %20 = arith.addf %19, %18 : vector<8x640xf32>
      %21 = tpu.reciprocal %20 {approx = true} : vector<8x640xf32> -> vector<8x640xf32>
      %22 = arith.mulf %15, %21 : vector<8x640xf32>
      %c0_16 = arith.constant 0 : index
      %c0_17 = arith.constant 0 : index
      %23 = vector.load %arg6[%c0_16, %c0_17] : memref<8x640xf32, #tpu.memory_space<vmem>>, vector<8x640xf32>
      tpu.vector_store %arg6[%c0_16, %c0_17], %22 {strides = array<i32>} : memref<8x640xf32, #tpu.memory_space<vmem>>, vector<8x640xf32>,
    } else {
    }
    return
  }
  func.func @transform_0(%arg0: i32, %arg1: i32, %arg2: i32) -> (i32, i32) {
    %c0_i32 = arith.constant 0 : i32
    return %arg0, %arg2 : i32, i32
  }
  func.func @transform_1(%arg0: i32, %arg1: i32, %arg2: i32) -> (i32, i32) {
    %c0_i32 = arith.constant 0 : i32
    return %arg2, %arg1 : i32, i32
  }
  func.func @transform_2(%arg0: i32, %arg1: i32, %arg2: i32) -> (i32, i32) {
    %c0_i32 = arith.constant 0 : i32
    %c0_i32_0 = arith.constant 0 : i32
    return %c0_i32, %arg1 : i32, i32
  }
  func.func @transform_3(%arg0: i32, %arg1: i32, %arg2: i32) -> (i32, i32) {
    %c0_i32 = arith.constant 0 : i32
    return %arg0, %arg1 : i32, i32
  }
}

</mosaic_0001>

<bundles_post_ra>
// kernel: tpu_custom_call.1
= control target key start
LH: loop header
LB: loop body
LE: loop exit
PB: predicated region body
PF: predicated region fallthrough
CT: control target
= control target key end

     0   :  { %8 = vsyncpa [#allocation4], 0  ;;  %s2599_s0 = inlined_call_operand.hbm [shape: bf16[8,320], index: 0, kind: input, shape index: {}]   ;;  %s2600_s1 = inlined_call_operand.hbm [shape: bf16[320,1280], index: 1, kind: input, shape index: {}]   ;;  %s2601_s2 = inlined_call_operand.hbm [shape: f32[1,1280], index: 2, kind: input, shape index: {}]   ;;  %s2602_s3 = inlined_call_operand.hbm [shape: f32[8,1280], index: 3, kind: output, shape index: {}]  }
   0x1   :  { %9 = vsyncpa [#allocation7], 0 }
   0x2   :  { %11 = vsyncpa [#allocation7 + $0x1], 0 }
   0x3   :  { %12 = vsyncpa [#allocation5], 0 }
   0x4   :  { %14 = vsyncpa [#allocation5 + $0x1], 0  ;;  %s2190_s12 = smov 0   ;;  %s2192_s13 = smov 0  }
   0x5   :  { %s2194_s14 = smov 0   ;;  %s2196_s15 = smov 0  }
   0x6   :  { %s2198_s16 = smov 0   ;;  %s2200_s17 = smov 0  }
   0x7 LB: > { %s35_s18 = sadd.s32 1, %s2160_s16  ;;  %s76_s19 = sadd.s32 1, %s2152_s14  ;;  %s2164_s17 = sphi %s2200_s17, %s20_s17   ;;  %s2160_s16 = sphi %s2198_s16, %s2612_s16   ;;  %s2156_s15 = sphi %s2196_s15, %s2611_s15   ;;  %s2152_s14 = sphi %s2194_s14, %s2610_s14   ;;  %s2148_s13 = sphi %s2192_s13, %s2609_s13   ;;  %s2144_s12 = sphi %s2190_s12, %s2608_s12  }
   0x8   : > { %p37_p0 = scmp.ge.s32.totalorder %s35_s18, 2  ;;  %p83_p1 = scmp.ne.s32.totalorder %s2152_s14, %s2148_s13 }
   0x9   : > { %p84_p2 = scmp.eq.s32.totalorder %s2164_s17, 0  ;;  %p1368_p3 = scmp.ge.s32.totalorder %s2164_s17, 2 }
   0xa   : > { %s2614_s18 = smov (%p37_p0, %s35_s18), 0  ;;  %p1913_p5 = scmp.lt.s32.totalorder %s2164_s17, 2 }
   0xb   : > { %p85_p4 = por %p84_p2, %p83_p1  ;;  %s72_s20 = ssub.s32 %s2160_s16, %s2614_s18 }
   0xc   : > { %s184_s21 = sand.u32 1, %s2164_s17   ;;  %p74_p6 = scmp.eq.s32.totalorder %s72_s20, 0 }
   0xd   : > { %s186_s22 = sand.u32 1, %s2152_s14   ;;  %s1780_s23 = smul.u32 20, %s2160_s16 }
   0xe   : > { %s2238_s24 = scalar_select %p74_p6, %s2152_s14, %s76_s19  }
   0xf   : > { %s1882_s25 = smul.u32 800, %s186_s22  ;;  %s196_s28 = scalar_lea.hbm %s2600_s1, %s1780_s23 }
  0x10   : > { %s197_s29 = sshll.u32 %s196_s28, 4  ;;  %p2245_p7 = pnand %p1913_p5, %p85_p4  ;;  %s198_s29 = int_to_ptr.hbm [resolvable:$true] %s197_s29 }
  0x11   : > { %s188_s4 = scalar_lea.vmem [#allocation6], %s1882_s25  ;;  %s2249_s6 = scalar_lea.sflag [#allocation7], %s184_s21 }
  0x12   : > { %s199_s5 = sshll.u32 %s188_s4, 4  ;;  %s2166_s7 = smov 640   ;;  %s200_s5 = int_to_ptr.vmem [resolvable:$true] %s199_s5 }
  0x13   : > { %s2167_s8 = smov 320   ;;  %s2168_s9 = smov 20  }
  0x14   : > { %1904 = dma.hbm_to_vmem [thread:$0]  (!%p2245_p7), %s198_s29, 12800, %s200_s5, %s2249_s6, %s2166_s7, %s2167_s8, %s2168_s9  }
  0x15   : > { %s2255_s10 = sadd.s32 4294967295, %s2164_s17   ;;  %s1365_s11 = sadd.s32 4294967294, %s2164_s17  }
  0x16   : > { %p89_p8 = scmp.ne.s32.totalorder %s2148_s13, %s2144_s12  ;;  %p90_p9 = scmp.eq.s32.totalorder %s2255_s10, 0 }
  0x17   : > { %p141_p10 = scmp.eq.s32.totalorder %s2255_s10, 1  ;;  %p147_p11 = scmp.eq.s32.totalorder %s1365_s11, 1 }
  0x18   : > { %p2264_p12 = por %p90_p9, %p89_p8  ;;  %p1366_p13 = scmp.ge.s32.totalorder %s2164_s17, 1 }
  0x19   : > { %p2272_p0 = por %p141_p10, %p83_p1  ;;  %p2276_p2 = por %p147_p11, %p89_p8 }
  0x1a   : > { %p154_p4 = scmp.lt.s32.totalorder %s2164_s17, 3  ;;  %s171_s26 = sshll.u32 %s2599_s0, 4  ;;  %s172_s26 = int_to_ptr.hbm [resolvable:$true] %s171_s26 }
  0x1b   : > { %s2169_s28 = smov [#allocation3]   ;;  %s1883_s4 = smul.u32 5, %s186_s22 }
  0x1c   : > { %p2284_p5 = pnand %p1366_p13, %p154_p4  ;;  %s173_s29 = sshll.u32 %s2169_s28, 4  ;;  %s174_s29 = int_to_ptr.vmem [resolvable:$true] %s173_s29 }
  0x1d   : > { %s214_s5 = smul.u32 5, %s2160_s16  ;;  %s213_s7 = scalar_lea.vmem [#allocation8], %s1883_s4 }
  0x1e   : > { %p1897_p1 = pneg %p2284_p5  ;;  %s221_s8 = sshll.u32 %s213_s7, 4  ;;  %s222_s8 = int_to_ptr.vmem [resolvable:$true] %s221_s8 }
  0x1f   : > { %s217_s23 = scalar_lea.hbm %s2601_s2, %s214_s5  ;;  %230 = sbr.rel (%p2284_p5) target bundleno = 314 (0x13a), region = 32 }
  0x20   : > { %p1898_p6 = pnand %p1897_p1, %p90_p9  ;;  %s219_s25 = sshll.u32 %s217_s23, 4  ;;  %s220_s25 = int_to_ptr.hbm [resolvable:$true] %s219_s25 }
  0x21   : > { %1907 = dma.hbm_to_vmem [thread:$0]  (!%p2245_p7), %s220_s25, 80, %s222_s8, %s2249_s6  }
  0x22   : > { %1900 = dma.hbm_to_vmem [thread:$0]  (!%p1898_p6), %s172_s26, 192, %s174_s29, [#allocation4]  }
  0x24   : > { %2131 = dma.done.wait (%p90_p9), [#allocation4], 192  }
  0x25   : > { %2133 = vsyncadd (%p90_p9), [#allocation4], 4294967104  ;;  %s237_s22 = sand.u32 1, %s2255_s10   ;;  %s2309_s28 = sand.u32 1, %s2148_s13  }
  0x26   : > { %s1884_s26 = smul.u32 800, %s2309_s28  ;;  %s238_s29 = scalar_lea.sflag [#allocation7], %s237_s22 }
  0x28   : > { %s2312_s30 = scalar_lea.vmem [#allocation6], %s1884_s26 }
  0x29   : > { %2135 = dma.done.wait (%p2264_p12), %s238_s29, 12880  }
  0x2a   : > { %2137 = vsyncadd (%p2264_p12), %s238_s29, 4294954416  ;;  %v1514_v0 = vld [vmem:[%s2312_s30 + $0x118] sm:$0xf]  ;;  %v1818_v1 = vld [vmem:[%s2312_s30 + $0x128] sm:$0xf0]  ;;  %vm952_vm0 = vcmask 523264  }
  0x2b   : > { %v1674_v2 = vld [vmem:[%s2312_s30 + $0x258] sm:$0xf]  ;;  %v1515_v3 = vor.u32 %v1818_v1, %v1514_v0  ;;  %v1858_v4 = vld [vmem:[%s2312_s30 + $0x268] sm:$0xf0]  ;;  %v1816_v9 = vld [vmem:[%s2312_s30 + $0x11c] sm:$0xf] }
  0x2c   : > { %v1754_v5 = vld [vmem:[%s2312_s30 + $0x2f8] sm:$0xf]  ;;  %v1878_v6 = vld [vmem:[%s2312_s30 + $0x308] sm:$0xf0]  ;;  %v1675_v7 = vor.u32 %v1858_v4, %v1674_v2  ;;  %v1516_v10 = vld [vmem:[%s2312_s30 + $0x12c] sm:$0xf0] }
  0x2d   : > { %v1755_v8 = vor.u32 %v1878_v6, %v1754_v5  ;;  %v1494_v11 = vld [vmem:[%s2312_s30 + $0xf0] sm:$0xf]  ;;  %956 = vmatpush.bf16.msra.mxu0 %v1515_v3  ;;  %v1519_v12 = vor.u32 %v1816_v9, %v1516_v10  ;;  %v1813_v13 = vld [vmem:[%s2312_s30 + $0x100] sm:$0xf0]  ;;  %v1811_v20 = vld [vmem:[%s2312_s30 + $0xf4] sm:$0xf] }
  0x2e   : > { %v1654_v14 = vld [vmem:[%s2312_s30 + $0x230] sm:$0xf]  ;;  %v1853_v15 = vld [vmem:[%s2312_s30 + $0x240] sm:$0xf0]  ;;  %969 = vmatpush.bf16.msra.mxu1 %v1675_v7  ;;  %v1495_v16 = vor.u32 %v1813_v13, %v1494_v11  ;;  %v1496_v22 = vld [vmem:[%s2312_s30 + $0x104] sm:$0xf0] }
  0x2f   : > { %986 = vmatpush.bf16.msra.mxu2 %v1755_v8  ;;  %v1655_v17 = vor.u32 %v1853_v15, %v1654_v14  ;;  %v1734_v18 = vld [vmem:[%s2312_s30 + $0x2d0] sm:$0xf]  ;;  %v1873_v19 = vld [vmem:[%s2312_s30 + $0x2e0] sm:$0xf0]  ;;  %995 = vmatpush.bf16.msra.mxu3 %v1519_v12  ;;  %v1474_v23 = vld [vmem:[%s2312_s30 + $0xc8] sm:$0xf]  ;;  %v1499_v25 = vor.u32 %v1811_v20, %v1496_v22 }
  0x30   : > { %v1735_v21 = vor.u32 %v1873_v19, %v1734_v18  ;;  %v1808_v24 = vld [vmem:[%s2312_s30 + $0xd8] sm:$0xf0]  ;;  %v1634_v26 = vld [vmem:[%s2312_s30 + $0x208] sm:$0xf]  ;;  %v1806_v31 = vld [vmem:[%s2312_s30 + $0xcc] sm:$0xf] }
  0x31   : > { %v1848_v27 = vld [vmem:[%s2312_s30 + $0x218] sm:$0xf0]  ;;  %v1714_v28 = vld [vmem:[%s2312_s30 + $0x2a8] sm:$0xf]  ;;  %957 = vmatpush.bf16.msra.mxu0 %v1495_v16  ;;  %v1475_v29 = vor.u32 %v1808_v24, %v1474_v23  ;;  %v1476_v32 = vld [vmem:[%s2312_s30 + $0xdc] sm:$0xf0] }
  0x32   : > { %v1868_v30 = vld [vmem:[%s2312_s30 + $0x2b8] sm:$0xf0]  ;;  %970 = vmatpush.bf16.msra.mxu1 %v1655_v17  ;;  %v1635_v33 = vor.u32 %v1848_v27, %v1634_v26  ;;  %v1454_v35 = vld [vmem:[%s2312_s30 + $0xa0] sm:$0xf]  ;;  %v1803_v36 = vld [vmem:[%s2312_s30 + $0xb0] sm:$0xf0]  ;;  %v1479_v38 = vor.u32 %v1806_v31, %v1476_v32 }
  0x33   : > { %987 = vmatpush.bf16.msra.mxu2 %v1735_v21  ;;  %v1715_v34 = vor.u32 %v1868_v30, %v1714_v28  ;;  %v1614_v37 = vld [vmem:[%s2312_s30 + $0x1e0] sm:$0xf]  ;;  %996 = vmatpush.bf16.msra.mxu3 %v1499_v25  ;;  %v1843_v39 = vld [vmem:[%s2312_s30 + $0x1f0] sm:$0xf0]  ;;  %v1801_v42 = vld [vmem:[%s2312_s30 + $0xa4] sm:$0xf]  ;;  %v1455_v45 = vor.u32 %v1803_v36, %v1454_v35 }
  0x34   : > { %v1694_v40 = vld [vmem:[%s2312_s30 + $0x280] sm:$0xf]  ;;  %v1863_v41 = vld [vmem:[%s2312_s30 + $0x290] sm:$0xf0]  ;;  %v1456_v43 = vld [vmem:[%s2312_s30 + $0xb4] sm:$0xf0]  ;;  %v1615_v47 = vor.u32 %v1843_v39, %v1614_v37 }
  0x35   : > { %v1856_v44 = vld [vmem:[%s2312_s30 + $0x25c] sm:$0xf]  ;;  %958 = vmatpush.bf16.msra.mxu0 %v1475_v29  ;;  %v1676_v46 = vld [vmem:[%s2312_s30 + $0x26c] sm:$0xf0]  ;;  %v1695_v48 = vor.u32 %v1863_v41, %v1694_v40  ;;  %v1434_v49 = vld [vmem:[%s2312_s30 + $0x78] sm:$0xf]  ;;  %v1459_v51 = vor.u32 %v1801_v42, %v1456_v43 }
  0x36   : > { %971 = vmatpush.bf16.msra.mxu1 %v1635_v33  ;;  %v1798_v50 = vld [vmem:[%s2312_s30 + $0x88] sm:$0xf0]  ;;  %v1679_v52 = vor.u32 %v1856_v44, %v1676_v46  ;;  %v1594_v53 = vld [vmem:[%s2312_s30 + $0x1b8] sm:$0xf]  ;;  %v1796_v55 = vld [vmem:[%s2312_s30 + $0x7c] sm:$0xf] }
  0x37   : > { %988 = vmatpush.bf16.msra.mxu2 %v1715_v34  ;;  %997 = vmatpush.bf16.msra.mxu3 %v1479_v38  ;;  %v1838_v54 = vld [vmem:[%s2312_s30 + $0x1c8] sm:$0xf0]  ;;  %v1436_v56 = vld [vmem:[%s2312_s30 + $0x8c] sm:$0xf0]  ;;  %v1851_v57 = vld [vmem:[%s2312_s30 + $0x234] sm:$0xf]  ;;  %v1435_v59 = vor.u32 %v1798_v50, %v1434_v49 }
  0x38   : > { %v1656_v58 = vld [vmem:[%s2312_s30 + $0x244] sm:$0xf0]  ;;  %v1595_v60 = vor.u32 %v1838_v54, %v1594_v53  ;;  %v1414_v61 = vld [vmem:[%s2312_s30 + $0x50] sm:$0xf]  ;;  %v1793_v62 = vld [vmem:[%s2312_s30 + $0x60] sm:$0xf0]  ;;  %v1439_v63 = vor.u32 %v1796_v55, %v1436_v56 }
  0x39   : > { %959 = vmatpush.bf16.msra.mxu0 %v1455_v45  ;;  %v1659_v0 = vor.u32 %v1851_v57, %v1656_v58  ;;  %v1574_v1 = vld [vmem:[%s2312_s30 + $0x190] sm:$0xf]  ;;  %v1833_v2 = vld [vmem:[%s2312_s30 + $0x1a0] sm:$0xf0]  ;;  %v1791_v3 = vld [vmem:[%s2312_s30 + $0x54] sm:$0xf]  ;;  %v1415_v7 = vor.u32 %v1793_v62, %v1414_v61 }
  0x3a   : > { %972 = vmatpush.bf16.msra.mxu1 %v1615_v47  ;;  %v1416_v4 = vld [vmem:[%s2312_s30 + $0x64] sm:$0xf0]  ;;  %v1846_v5 = vld [vmem:[%s2312_s30 + $0x20c] sm:$0xf]  ;;  %v1636_v6 = vld [vmem:[%s2312_s30 + $0x21c] sm:$0xf0]  ;;  %v1575_v9 = vor.u32 %v1833_v2, %v1574_v1 }
  0x3b   : > { %989 = vmatpush.bf16.msra.mxu2 %v1695_v48  ;;  %998 = vmatpush.bf16.msra.mxu3 %v1459_v51  ;;  %v1394_v8 = vld [vmem:[%s2312_s30 + $0x28] sm:$0xf]  ;;  %v1788_v10 = vld [vmem:[%s2312_s30 + $0x38] sm:$0xf0]  ;;  %v1419_v13 = vor.u32 %v1791_v3, %v1416_v4  ;;  %v1639_v14 = vor.u32 %v1846_v5, %v1636_v6  ;;  %v1786_v16 = vld [vmem:[%s2312_s30 + $0x2c] sm:$0xf] }
  0x3c   : > { %v1554_v11 = vld [vmem:[%s2312_s30 + $0x168] sm:$0xf]  ;;  %v301_v12 = vld [vmem:[#allocation3 + $0x8] sm:$0xf]  ;;  %v1396_v17 = vld [vmem:[%s2312_s30 + $0x3c] sm:$0xf0]  ;;  %v1395_v22 = vor.u32 %v1788_v10, %v1394_v8 }
  0x3d   : > { %960 = vmatpush.bf16.msra.mxu0 %v1435_v59  ;;  %v1828_v15 = vld [vmem:[%s2312_s30 + $0x178] sm:$0xf0]  ;;  %v426_v18 = vunpack.c.l.b16 %v301_v12  ;;  %v1841_v19 = vld [vmem:[%s2312_s30 + $0x1e4] sm:$0xf]  ;;  %v1616_v20 = vld [vmem:[%s2312_s30 + $0x1f4] sm:$0xf0]  ;;  %v1399_v30 = vor.u32 %v1786_v16, %v1396_v17 }
  0x3e   : > { %973 = vmatpush.bf16.msra.mxu1 %v1595_v60  ;;  %v1374_v21 = vld [vmem:[%s2312_s30] sm:$0xf]  ;;  %v1783_v23 = vld [vmem:[%s2312_s30 + $0x10] sm:$0xf0]  ;;  %v1555_v26 = vor.u32 %v1828_v15, %v1554_v11  ;;  %v1781_v28 = vld [vmem:[%s2312_s30 + $0x4] sm:$0xf]  ;;  %v1619_v31 = vor.u32 %v1841_v19, %v1616_v20 }
  0x3f   : > { %1008 = vmatpush.bf16.msrb.mxu2 %v1679_v52  ;;  %999 = vmatpush.bf16.msra.mxu3 %v1439_v63  ;;  %v1534_v24 = vld [vmem:[%s2312_s30 + $0x140] sm:$0xf]  ;;  %v2379_v25 = vpack.c.b16 %v426_v18, %v426_v18  ;;  %v1823_v27 = vld [vmem:[%s2312_s30 + $0x150] sm:$0xf0]  ;;  %v1376_v32 = vld [vmem:[%s2312_s30 + $0x14] sm:$0xf0]  ;;  %v1375_v38 = vor.u32 %v1783_v23, %v1374_v21 }
  0x40   : > { %v300_v29 = vld [vmem:[#allocation3] sm:$0xff]  ;;  %v1876_v33 = vld [vmem:[%s2312_s30 + $0x2fc] sm:$0xf]  ;;  %v1756_v34 = vld [vmem:[%s2312_s30 + $0x30c] sm:$0xf0]  ;;  %v1535_v44 = vor.u32 %v1823_v27, %v1534_v24  ;;  %v1379_v46 = vor.u32 %v1781_v28, %v1376_v32  ;;  %s1885_s6 = smul.u32 5, %s2309_s28 }
  0x41   : > { %961 = vmatpush.bf16.msra.mxu0 %v1415_v7  ;;  %1772 = vmatmul.msk.bf16.vlgmr.msra.gmra.mxu2 %vm952_vm0, %v2379_v25  ;;  %v1836_v35 = vld [vmem:[%s2312_s30 + $0x1bc] sm:$0xf]  ;;  %v1596_v36 = vld [vmem:[%s2312_s30 + $0x1cc] sm:$0xf0]  ;;  %v1522_v37 = vld [vmem:[%s2312_s30 + $0x120] sm:$0xf]  ;;  %v424_v42 = vunpack.c.l.b16 %v300_v29  ;;  %v425_v43 = vunpack.c.h.b16 %v300_v29  ;;  %v1759_v45 = vor.u32 %v1876_v33, %v1756_v34 }
  0x42   : > { %974 = vmatpush.bf16.msra.mxu1 %v1575_v9  ;;  %v1819_v39 = vld [vmem:[%s2312_s30 + $0x130] sm:$0xf0]  ;;  %v1682_v40 = vld [vmem:[%s2312_s30 + $0x260] sm:$0xf]  ;;  %v1599_v47 = vor.u32 %v1836_v35, %v1596_v36  ;;  %v1736_v49 = vld [vmem:[%s2312_s30 + $0x2e4] sm:$0xf0] }
  0x43   : > { %1009 = vmatpush.bf16.msrb.mxu2 %v1659_v0  ;;  %1000 = vmatpush.bf16.msra.mxu3 %v1419_v13  ;;  %v1859_v41 = vld [vmem:[%s2312_s30 + $0x270] sm:$0xf0]  ;;  %v1523_v50 = vor.u32 %v1819_v39, %v1522_v37  ;;  %v1576_v53 = vld [vmem:[%s2312_s30 + $0x1a4] sm:$0xf0]  ;;  %v1502_v54 = vld [vmem:[%s2312_s30 + $0xf8] sm:$0xf]  ;;  %v2402_v58 = vpack.c.b16 %v424_v42, %v424_v42  ;;  %v2404_v59 = vpack.c.b16 %v425_v43, %v425_v43 }
  0x44   : > { %v1871_v48 = vld [vmem:[%s2312_s30 + $0x2d4] sm:$0xf]  ;;  %v1683_v51 = vor.u32 %v1859_v41, %v1682_v40  ;;  %v1814_v55 = vld [vmem:[%s2312_s30 + $0x108] sm:$0xf0]  ;;  %v1662_v56 = vld [vmem:[%s2312_s30 + $0x238] sm:$0xf] }
  0x45   : > { %962 = vmatpush.bf16.msra.mxu0 %v1395_v22  ;;  %v1831_v52 = vld [vmem:[%s2312_s30 + $0x194] sm:$0xf]  ;;  %v1854_v57 = vld [vmem:[%s2312_s30 + $0x248] sm:$0xf0]  ;;  %v1739_v60 = vor.u32 %v1871_v48, %v1736_v49  ;;  %v1716_v63 = vld [vmem:[%s2312_s30 + $0x2bc] sm:$0xf0]  ;;  %v1503_v0 = vor.u32 %v1814_v55, %v1502_v54 }
  0x46   : > { %975 = vmatpush.bf16.msra.mxu1 %v1555_v26  ;;  %v1579_v61 = vor.u32 %v1831_v52, %v1576_v53  ;;  %v1866_v62 = vld [vmem:[%s2312_s30 + $0x2ac] sm:$0xf]  ;;  %v1663_v1 = vor.u32 %v1854_v57, %v1662_v56  ;;  %v1556_v3 = vld [vmem:[%s2312_s30 + $0x17c] sm:$0xf0]  ;;  %v1482_v4 = vld [vmem:[%s2312_s30 + $0xd0] sm:$0xf] }
  0x47   : > { %1010 = vmatpush.bf16.msrb.mxu2 %v1639_v14  ;;  %1001 = vmatpush.bf16.msra.mxu3 %v1399_v30  ;;  %v1826_v2 = vld [vmem:[%s2312_s30 + $0x16c] sm:$0xf]  ;;  %v1809_v5 = vld [vmem:[%s2312_s30 + $0xe0] sm:$0xf0]  ;;  %v1642_v6 = vld [vmem:[%s2312_s30 + $0x210] sm:$0xf]  ;;  %v1719_v8 = vor.u32 %v1866_v62, %v1716_v63 }
  0x48   : > { %v1849_v7 = vld [vmem:[%s2312_s30 + $0x220] sm:$0xf0]  ;;  %v1559_v10 = vor.u32 %v1826_v2, %v1556_v3  ;;  %v1536_v11 = vld [vmem:[%s2312_s30 + $0x154] sm:$0xf0]  ;;  %v1483_v14 = vor.u32 %v1809_v5, %v1482_v4  ;;  %v1462_v16 = vld [vmem:[%s2312_s30 + $0xa8] sm:$0xf] }
  0x49   : > { %963 = vmatpush.bf16.msra.mxu0 %v1375_v38  ;;  %v1821_v9 = vld [vmem:[%s2312_s30 + $0x144] sm:$0xf]  ;;  %v1696_v13 = vld [vmem:[%s2312_s30 + $0x294] sm:$0xf0]  ;;  %v1643_v15 = vor.u32 %v1849_v7, %v1642_v6  ;;  %v1762_v17 = vld [vmem:[%s2312_s30 + $0x300] sm:$0xf] }
  0x4a   : > { %976 = vmatpush.bf16.msra.mxu1 %v1535_v44  ;;  %v1861_v12 = vld [vmem:[%s2312_s30 + $0x284] sm:$0xf]  ;;  %v1879_v18 = vld [vmem:[%s2312_s30 + $0x310] sm:$0xf0]  ;;  %v1804_v19 = vld [vmem:[%s2312_s30 + $0xb8] sm:$0xf0]  ;;  %v1539_v26 = vor.u32 %v1821_v9, %v1536_v11 }
  0x4b   : > { %1011 = vmatpush.bf16.msrb.mxu2 %v1619_v31  ;;  %1002 = vmatpush.bf16.msra.mxu3 %v1379_v46  ;;  %v1622_v20 = vld [vmem:[%s2312_s30 + $0x1e8] sm:$0xf]  ;;  %v1844_v21 = vld [vmem:[%s2312_s30 + $0x1f8] sm:$0xf0]  ;;  %v1699_v22 = vor.u32 %v1861_v12, %v1696_v13  ;;  %v1817_v23 = vld [vmem:[%s2312_s30 + $0x124] sm:$0xf]  ;;  %v1763_v27 = vor.u32 %v1879_v18, %v1762_v17  ;;  %v1463_v28 = vor.u32 %v1804_v19, %v1462_v16 }
  0x4c   : > { %964 = vmatmul.bf16.vlgmr.msra.gmra.mxu0 %v2402_v58  ;;  %v1524_v24 = vld [vmem:[%s2312_s30 + $0x134] sm:$0xf0]  ;;  %v1623_v29 = vor.u32 %v1844_v21, %v1622_v20  ;;  %v1442_v30 = vld [vmem:[%s2312_s30 + $0x80] sm:$0xf]  ;;  %v1874_v32 = vld [vmem:[%s2312_s30 + $0x2e8] sm:$0xf0] }
  0x4d   : > { %1025 = vmatpush.bf16.msrb.mxu0 %v1759_v45  ;;  %977 = vmatmul.bf16.vlgmr.msra.gmra.mxu1 %v2404_v59  ;;  %v1742_v31 = vld [vmem:[%s2312_s30 + $0x2d8] sm:$0xf]  ;;  %v1527_v33 = vor.u32 %v1817_v23, %v1524_v24  ;;  %v1799_v34 = vld [vmem:[%s2312_s30 + $0x90] sm:$0xf0]  ;;  %v1602_v35 = vld [vmem:[%s2312_s30 + $0x1c0] sm:$0xf] }
  0x4e   : > { %1034 = vmatpush.bf16.msrb.mxu1 %v1523_v50  ;;  %1003 = vmatmul.bf16.vlgmr.msra.gmra.mxu3 %v2402_v58  ;;  %v1839_v36 = vld [vmem:[%s2312_s30 + $0x1d0] sm:$0xf0]  ;;  %v1812_v37 = vld [vmem:[%s2312_s30 + $0xfc] sm:$0xf]  ;;  %v1504_v38 = vld [vmem:[%s2312_s30 + $0x10c] sm:$0xf0]  ;;  %v1743_v39 = vor.u32 %v1874_v32, %v1742_v31  ;;  %v1443_v40 = vor.u32 %v1799_v34, %v1442_v30 }
  0x4f   : > { %1012 = vmatpush.bf16.msrb.mxu2 %v1599_v47  ;;  %1047 = vmatpush.bf16.msrb.mxu3 %v1683_v51  ;;  %v1603_v41 = vor.u32 %v1839_v36, %v1602_v35  ;;  %v1422_v42 = vld [vmem:[%s2312_s30 + $0x58] sm:$0xf]  ;;  %v1722_v43 = vld [vmem:[%s2312_s30 + $0x2b0] sm:$0xf]  ;;  %v1869_v44 = vld [vmem:[%s2312_s30 + $0x2c0] sm:$0xf0]  ;;  %v1507_v45 = vor.u32 %v1812_v37, %v1504_v38 }
  0x50   : > { %v1794_v46 = vld [vmem:[%s2312_s30 + $0x68] sm:$0xf0]  ;;  %v1582_v47 = vld [vmem:[%s2312_s30 + $0x198] sm:$0xf]  ;;  %v1807_v49 = vld [vmem:[%s2312_s30 + $0xd4] sm:$0xf]  ;;  %v1723_v51 = vor.u32 %v1869_v44, %v1722_v43 }
  0x51   : > { %1026 = vmatpush.bf16.msrb.mxu0 %v1739_v60  ;;  %v1834_v48 = vld [vmem:[%s2312_s30 + $0x1a8] sm:$0xf0]  ;;  %v1484_v50 = vld [vmem:[%s2312_s30 + $0xe4] sm:$0xf0]  ;;  %v1402_v52 = vld [vmem:[%s2312_s30 + $0x30] sm:$0xf]  ;;  %v1423_v53 = vor.u32 %v1794_v46, %v1422_v42 }
  0x52   : > { %1035 = vmatpush.bf16.msrb.mxu1 %v1503_v0  ;;  %v1583_v54 = vor.u32 %v1834_v48, %v1582_v47  ;;  %v1789_v55 = vld [vmem:[%s2312_s30 + $0x40] sm:$0xf0]  ;;  %v1702_v56 = vld [vmem:[%s2312_s30 + $0x288] sm:$0xf]  ;;  %v1864_v57 = vld [vmem:[%s2312_s30 + $0x298] sm:$0xf0]  ;;  %v1487_v60 = vor.u32 %v1807_v49, %v1484_v50 }
  0x53   : > { %1013 = vmatpush.bf16.msrb.mxu2 %v1579_v61  ;;  %1048 = vmatpush.bf16.msrb.mxu3 %v1663_v1  ;;  %v1562_v61 = vld [vmem:[%s2312_s30 + $0x170] sm:$0xf]  ;;  %v1829_v62 = vld [vmem:[%s2312_s30 + $0x180] sm:$0xf0]  ;;  %v1802_v63 = vld [vmem:[%s2312_s30 + $0xac] sm:$0xf]  ;;  %v1703_v3 = vor.u32 %v1864_v57, %v1702_v56  ;;  %v1403_v4 = vor.u32 %v1789_v55, %v1402_v52 }
  0x54   : > { %v1464_v0 = vld [vmem:[%s2312_s30 + $0xbc] sm:$0xf0]  ;;  %v1857_v1 = vld [vmem:[%s2312_s30 + $0x264] sm:$0xf]  ;;  %v1684_v2 = vld [vmem:[%s2312_s30 + $0x274] sm:$0xf0]  ;;  %v1563_v5 = vor.u32 %v1829_v62, %v1562_v61 }
  0x55   : > { %1027 = vmatpush.bf16.msrb.mxu0 %v1719_v8  ;;  %v1382_v6 = vld [vmem:[%s2312_s30 + $0x8] sm:$0xf]  ;;  %v1784_v7 = vld [vmem:[%s2312_s30 + $0x18] sm:$0xf0]  ;;  %v1467_v9 = vor.u32 %v1802_v63, %v1464_v0  ;;  %v1877_v12 = vld [vmem:[%s2312_s30 + $0x304] sm:$0xf] }
  0x56   : > { %1036 = vmatpush.bf16.msrb.mxu1 %v1483_v14  ;;  %v1542_v8 = vld [vmem:[%s2312_s30 + $0x148] sm:$0xf]  ;;  %v1824_v11 = vld [vmem:[%s2312_s30 + $0x158] sm:$0xf0]  ;;  %v1764_v13 = vld [vmem:[%s2312_s30 + $0x314] sm:$0xf0]  ;;  %v1383_v20 = vor.u32 %v1784_v7, %v1382_v6 }
  0x57   : > { %1014 = vmatpush.bf16.msrb.mxu2 %v1559_v10  ;;  %1049 = vmatpush.bf16.msrb.mxu3 %v1643_v15  ;;  %v1687_v10 = vor.u32 %v1857_v1, %v1684_v2  ;;  %v1530_v14 = vld [vmem:[%s2312_s30 + $0x128] sm:$0xf]  ;;  %v1820_v15 = vld [vmem:[%s2312_s30 + $0x138] sm:$0xf0]  ;;  %v1797_v16 = vld [vmem:[%s2312_s30 + $0x84] sm:$0xf]  ;;  %v1543_v21 = vor.u32 %v1824_v11, %v1542_v8 }
  0x58   : > { %v1444_v17 = vld [vmem:[%s2312_s30 + $0x94] sm:$0xf0]  ;;  %v1852_v18 = vld [vmem:[%s2312_s30 + $0x23c] sm:$0xf]  ;;  %v1664_v19 = vld [vmem:[%s2312_s30 + $0x24c] sm:$0xf0]  ;;  %v1531_v23 = vor.u32 %v1820_v15, %v1530_v14 }
  0x59   : > { %1028 = vmatpush.bf16.msrb.mxu0 %v1699_v22  ;;  %v1767_v22 = vor.u32 %v1877_v12, %v1764_v13  ;;  %v1872_v24 = vld [vmem:[%s2312_s30 + $0x2dc] sm:$0xf]  ;;  %v1815_v30 = vld [vmem:[%s2312_s30 + $0x110] sm:$0xf0]  ;;  %v1424_v32 = vld [vmem:[%s2312_s30 + $0x6c] sm:$0xf0] }
  0x5a   : > { %1037 = vmatpush.bf16.msrb.mxu1 %v1463_v28  ;;  %v1667_v28 = vor.u32 %v1852_v18, %v1664_v19  ;;  %v1792_v31 = vld [vmem:[%s2312_s30 + $0x5c] sm:$0xf]  ;;  %v1644_v34 = vld [vmem:[%s2312_s30 + $0x224] sm:$0xf0]  ;;  %v1867_v37 = vld [vmem:[%s2312_s30 + $0x2b4] sm:$0xf] }
  0x5b   : > { %1015 = vmatpush.bf16.msrb.mxu2 %v1539_v26  ;;  %1050 = vmatpush.bf16.msrb.mxu3 %v1623_v29  ;;  %v1744_v26 = vld [vmem:[%s2312_s30 + $0x2ec] sm:$0xf0]  ;;  %v1510_v29 = vld [vmem:[%s2312_s30 + $0x100] sm:$0xf]  ;;  %v1724_v38 = vld [vmem:[%s2312_s30 + $0x2c4] sm:$0xf0] }
  0x5c   : > { %1773 = vmatmul.msk.bf16.vlgmr.msrb.gmra.mxu0 %vm952_vm0, %v2379_v25  ;;  %v1747_v35 = vor.u32 %v1872_v24, %v1744_v26  ;;  %v1511_v36 = vor.u32 %v1815_v30, %v1510_v29  ;;  %v1810_v42 = vld [vmem:[%s2312_s30 + $0xe8] sm:$0xf0]  ;;  %v1787_v43 = vld [vmem:[%s2312_s30 + $0x34] sm:$0xf]  ;;  %v1404_v44 = vld [vmem:[%s2312_s30 + $0x44] sm:$0xf0]  ;;  %v1727_v47 = vor.u32 %v1867_v37, %v1724_v38 }
  0x5d   : > { %1064 = vmatpush.bf16.msra.mxu0 %v1763_v27  ;;  %v1447_v27 = vor.u32 %v1797_v16, %v1444_v17  ;;  %v1624_v46 = vld [vmem:[%s2312_s30 + $0x1fc] sm:$0xf0]  ;;  %v1862_v49 = vld [vmem:[%s2312_s30 + $0x28c] sm:$0xf]  ;;  %v1407_v52 = vor.u32 %v1787_v43, %v1404_v44  ;;  %v1837_v57 = vld [vmem:[%s2312_s30 + $0x1c4] sm:$0xf] }
  0x5e   : > { %1016 = vmatmul.bf16.vlgmr.msrb.gmra.mxu2 %v2404_v59  ;;  %1038 = vmatpush.bf16.msrb.mxu1 %v1443_v40  ;;  %v1704_v50 = vld [vmem:[%s2312_s30 + $0x29c] sm:$0xf0]  ;;  %v1782_v55 = vld [vmem:[%s2312_s30 + $0xc] sm:$0xf]  ;;  %v1690_v61 = vld [vmem:[%s2312_s30 + $0x268] sm:$0xf] }
  0x5f   : > { %1073 = vmatpush.bf16.msra.mxu2 %v1527_v33  ;;  %1051 = vmatpush.bf16.msrb.mxu3 %v1603_v41  ;;  %v1847_v33 = vld [vmem:[%s2312_s30 + $0x214] sm:$0xf]  ;;  %v1490_v41 = vld [vmem:[%s2312_s30 + $0xd8] sm:$0xf]  ;;  %v1384_v56 = vld [vmem:[%s2312_s30 + $0x1c] sm:$0xf0]  ;;  %v1707_v1 = vor.u32 %v1862_v49, %v1704_v50 }
  0x60   : > { %v1647_v40 = vor.u32 %v1847_v33, %v1644_v34  ;;  %v1491_v48 = vor.u32 %v1810_v42, %v1490_v41  ;;  %v1860_v62 = vld [vmem:[%s2312_s30 + $0x278] sm:$0xf0]  ;;  %v1770_v63 = vld [vmem:[%s2312_s30 + $0x308] sm:$0xf]  ;;  %v1855_v12 = vld [vmem:[%s2312_s30 + $0x250] sm:$0xf0] }
  0x61   : > { %1065 = vmatpush.bf16.msra.mxu0 %v1743_v39  ;;  %v1427_v39 = vor.u32 %v1792_v31, %v1424_v32  ;;  %v1880_v0 = vld [vmem:[%s2312_s30 + $0x318] sm:$0xf0]  ;;  %v1691_v7 = vor.u32 %v1860_v62, %v1690_v61  ;;  %v1750_v13 = vld [vmem:[%s2312_s30 + $0x2e0] sm:$0xf]  ;;  %v1875_v14 = vld [vmem:[%s2312_s30 + $0x2f0] sm:$0xf0] }
  0x62   : > { %1039 = vmatpush.bf16.msrb.mxu1 %v1423_v53  ;;  %v1800_v6 = vld [vmem:[%s2312_s30 + $0x98] sm:$0xf0]  ;;  %v1771_v11 = vor.u32 %v1880_v0, %v1770_v63  ;;  %v1430_v17 = vld [vmem:[%s2312_s30 + $0x60] sm:$0xf]  ;;  %v1795_v18 = vld [vmem:[%s2312_s30 + $0x70] sm:$0xf0] }
  0x63   : > { %1074 = vmatpush.bf16.msra.mxu2 %v1507_v45  ;;  %1052 = vmatpush.bf16.msrb.mxu3 %v1583_v54  ;;  %v1842_v45 = vld [vmem:[%s2312_s30 + $0x1ec] sm:$0xf]  ;;  %v1805_v54 = vld [vmem:[%s2312_s30 + $0xc0] sm:$0xf0]  ;;  %v1832_v8 = vld [vmem:[%s2312_s30 + $0x19c] sm:$0xf] }
  0x64   : > { %v1627_v53 = vor.u32 %v1842_v45, %v1624_v46  ;;  %v1850_v24 = vld [vmem:[%s2312_s30 + $0x228] sm:$0xf0]  ;;  %v1730_v26 = vld [vmem:[%s2312_s30 + $0x2b8] sm:$0xf]  ;;  %v1544_v34 = vld [vmem:[%s2312_s30 + $0x15c] sm:$0xf0] }
  0x65   : > { %1066 = vmatpush.bf16.msra.mxu0 %v1723_v51  ;;  %v1470_v51 = vld [vmem:[%s2312_s30 + $0xb0] sm:$0xf]  ;;  %v1410_v30 = vld [vmem:[%s2312_s30 + $0x38] sm:$0xf]  ;;  %v1790_v31 = vld [vmem:[%s2312_s30 + $0x48] sm:$0xf0] }
  0x66   : > { %1040 = vmatpush.bf16.msrb.mxu1 %v1403_v4  ;;  %v1471_v2 = vor.u32 %v1805_v54, %v1470_v51  ;;  %v1822_v33 = vld [vmem:[%s2312_s30 + $0x14c] sm:$0xf]  ;;  %v1845_v37 = vld [vmem:[%s2312_s30 + $0x200] sm:$0xf0]  ;;  %v1710_v38 = vld [vmem:[%s2312_s30 + $0x290] sm:$0xf] }
  0x67   : > { %1075 = vmatpush.bf16.msra.mxu2 %v1487_v60  ;;  %1053 = vmatpush.bf16.msrb.mxu3 %v1563_v5  ;;  %v1604_v60 = vld [vmem:[%s2312_s30 + $0x1d4] sm:$0xf0]  ;;  %v1450_v5 = vld [vmem:[%s2312_s30 + $0x88] sm:$0xf]  ;;  %v1547_v41 = vor.u32 %v1822_v33, %v1544_v34  ;;  %v1390_v42 = vld [vmem:[%s2312_s30 + $0x10] sm:$0xf] }
  0x68   : > { %v1607_v4 = vor.u32 %v1837_v57, %v1604_v60  ;;  %v1451_v15 = vor.u32 %v1800_v6, %v1450_v5  ;;  %v1785_v43 = vld [vmem:[%s2312_s30 + $0x20] sm:$0xf0]  ;;  %v1610_v46 = vld [vmem:[%s2312_s30 + $0x1c8] sm:$0xf]  ;;  %v1590_v50 = vld [vmem:[%s2312_s30 + $0x1a0] sm:$0xf] }
  0x69   : > { %1067 = vmatpush.bf16.msra.mxu0 %v1703_v3  ;;  %v1387_v3 = vor.u32 %v1782_v55, %v1384_v56  ;;  %v1835_v51 = vld [vmem:[%s2312_s30 + $0x1b0] sm:$0xf0]  ;;  %v1830_v54 = vld [vmem:[%s2312_s30 + $0x188] sm:$0xf0]  ;;  %v1550_v56 = vld [vmem:[%s2312_s30 + $0x150] sm:$0xf] }
  0x6a   : > { %1041 = vmatpush.bf16.msrb.mxu1 %v1383_v20  ;;  %v1827_v20 = vld [vmem:[%s2312_s30 + $0x174] sm:$0xf]  ;;  %v1825_v57 = vld [vmem:[%s2312_s30 + $0x160] sm:$0xf0]  ;;  %s251_s10 = scalar_lea.vmem [#allocation8], %s1885_s6  ;;  %s1886_s19 = smul.u32 40, %s2309_s28 }
  0x6b   : > { %1076 = vmatpush.bf16.msra.mxu2 %v1467_v9  ;;  %1054 = vmatpush.bf16.msrb.mxu3 %v1543_v21  ;;  %v1584_v9 = vld [vmem:[%s2312_s30 + $0x1ac] sm:$0xf0]  ;;  %v1564_v21 = vld [vmem:[%s2312_s30 + $0x184] sm:$0xf0]  ;;  %v1551_v60 = vor.u32 %v1825_v57, %v1550_v56  ;;  %s1881_s4 = smul.u32 40, %s2156_s15  ;;  %s1222_s23 = scalar_lea.sflag [#allocation5], %s2309_s28 }
  0x6c   : > { %1774 = vmatmul.msk.bf16.vlgmr.msra.gmra.mxu0 %vm952_vm0, %v2379_v25  ;;  %v1587_v16 = vor.u32 %v1832_v8, %v1584_v9  ;;  %v1567_v29 = vor.u32 %v1827_v20, %v1564_v21  ;;  %v2545_v62 = vld [vmem:[%s251_s10] sm:$0x1f]  ;;  %s2550_s27 = scalar_lea.vmem [#allocation9], %s1886_s19  ;;  %s2098_s29 = scalar_lea.hbm %s2602_s3, 80 }
  0x6d   : > { %1086 = vmatpush.bf16.msrb.mxu0 %v1687_v10  ;;  %1042 = vmatmul.bf16.vlgmr.msrb.gmra.mxu1 %v2402_v58  ;;  %v1670_v10 = vld [vmem:[%s2312_s30 + $0x240] sm:$0xf]  ;;  %s1235_s8 = scalar_lea.hbm %s2602_s3, %s1881_s4  ;;  %s1237_s9 = sshll.u32 %s2550_s27, 4  ;;  %s1238_s9 = int_to_ptr.vmem [resolvable:$true] %s1237_s9 }
  0x6e   : > { %1103 = vmatpush.bf16.msra.mxu1 %v1767_v22  ;;  %1055 = vmatmul.bf16.vlgmr.msrb.gmra.mxu3 %v2404_v59  ;;  %v1671_v19 = vor.u32 %v1855_v12, %v1670_v10  ;;  %v1650_v22 = vld [vmem:[%s2312_s30 + $0x218] sm:$0xf]  ;;  %s1239_s11 = sshll.u32 %s1235_s8, 4  ;;  %s1240_s11 = int_to_ptr.hbm [resolvable:$true] %s1239_s11 }
  0x6f   : > { %1112 = vmatpush.bf16.msra.mxu3 %v1531_v23  ;;  %1077 = vmatpush.bf16.msra.mxu2 %v1447_v27  ;;  %v1751_v23 = vor.u32 %v1875_v14, %v1750_v13  ;;  %v1870_v27 = vld [vmem:[%s2312_s30 + $0x2c8] sm:$0xf0]  ;;  %v1651_v32 = vor.u32 %v1850_v24, %v1650_v22  ;;  %v1172_v14 = vperm.slane %v2545_v62, 1  ;;  %s2092_s25 = sshra.s32 %s1240_s11, 4  ;;  %s2093_s25 = int_to_ptr.hbm [resolvable:$true] %s2092_s25 }
  0x70   : > { %s2094_s22 = scalar_lea.hbm %s2093_s25, 40  ;;  %p2099_p10 = scmp.lt.s32.totalorder %s2093_s25, %s2602_s3 }
  0x71   : > { %1087 = vmatpush.bf16.msrb.mxu0 %v1667_v28  ;;  %v1431_v28 = vor.u32 %v1795_v18, %v1430_v17  ;;  %p2095_p7 = scmp.ne.s32.totalorder %s2093_s25, %s2094_s22  ;;  %p2100_p11 = scmp.lt.s32.totalorder %s2098_s29, %s2094_s22 }
  0x72   : > { %1104 = vmatpush.bf16.msra.mxu1 %v1747_v35  ;;  %v1630_v35 = vld [vmem:[%s2312_s30 + $0x1f0] sm:$0xf] }
  0x73   : > { %1113 = vmatpush.bf16.msra.mxu3 %v1511_v36  ;;  %1078 = vmatpush.bf16.msra.mxu2 %v1427_v39  ;;  %v1731_v36 = vor.u32 %v1870_v27, %v1730_v26  ;;  %v1865_v39 = vld [vmem:[%s2312_s30 + $0x2a0] sm:$0xf0]  ;;  %v1631_v44 = vor.u32 %v1845_v37, %v1630_v35  ;;  %p2096_p8 = pnand %p2095_p7, %p2272_p0  ;;  %p2101_p12 = por %p2100_p11, %p2099_p10 }
  0x74   : > { %v1711_v45 = vor.u32 %v1865_v39, %v1710_v38 }
  0x75   : > { %1088 = vmatpush.bf16.msrb.mxu0 %v1647_v40  ;;  %v1411_v40 = vor.u32 %v1790_v31, %v1410_v30  ;;  %v1173_v30 = vperm.slane %v2545_v62, 2  ;;  %p2097_p9 = pneg %p2096_p8 }
  0x76   : > { %1105 = vmatpush.bf16.msra.mxu1 %v1727_v47  ;;  %v1840_v47 = vld [vmem:[%s2312_s30 + $0x1d8] sm:$0xf0] }
  0x77   : > { %1114 = vmatpush.bf16.msra.mxu3 %v1491_v48  ;;  %1079 = vmatpush.bf16.msra.mxu2 %v1407_v52  ;;  %v1391_v48 = vor.u32 %v1785_v43, %v1390_v42  ;;  %v1611_v49 = vor.u32 %v1840_v47, %v1610_v46  ;;  %v1591_v52 = vor.u32 %v1835_v51, %v1590_v50  ;;  %v1174_v47 = vperm.slane %v2545_v62, 3  ;;  %p2102_p13 = pnand %p2101_p12, %p2097_p9 }
  0x79   : > { %1089 = vmatpush.bf16.msrb.mxu0 %v1627_v53  ;;  %v1570_v53 = vld [vmem:[%s2312_s30 + $0x178] sm:$0xf] }
  0x7a   : > { %1106 = vmatpush.bf16.msra.mxu1 %v1707_v1  ;;  %v1571_v55 = vor.u32 %v1830_v54, %v1570_v53  ;;  %v1171_v1 = vperm.slane %v2545_v62, 0 }
  0x7b   : > { %1115 = vmatpush.bf16.msra.mxu3 %v1471_v2  ;;  %1080 = vmatpush.bf16.msra.mxu2 %v1387_v3 }
  0x7d   : > { %1090 = vmatpush.bf16.msrb.mxu0 %v1607_v4  ;;  %1775 = vmatmul.msk.bf16.vlgmr.msra.gmra.mxu1 %vm952_vm0, %v2379_v25 }
  0x7e   : > { %1125 = vmatpush.bf16.msrb.mxu1 %v1691_v7  ;;  %1081 = vmatmul.bf16.vlgmr.msra.gmra.mxu2 %v2402_v58 }
  0x7f   : > { %1142 = vmatpush.bf16.msrb.mxu2 %v1771_v11  ;;  %1116 = vmatpush.bf16.msra.mxu3 %v1451_v15 }
  0x81   : > { %1091 = vmatpush.bf16.msrb.mxu0 %v1587_v16 }
  0x82   : > { %1126 = vmatpush.bf16.msrb.mxu1 %v1671_v19 }
  0x83   : > { %1143 = vmatpush.bf16.msrb.mxu2 %v1751_v23  ;;  %1117 = vmatpush.bf16.msra.mxu3 %v1431_v28 }
  0x85   : > { %1092 = vmatpush.bf16.msrb.mxu0 %v1567_v29 }
  0x86   : > { %1127 = vmatpush.bf16.msrb.mxu1 %v1651_v32 }
  0x87   : > { %1144 = vmatpush.bf16.msrb.mxu2 %v1731_v36  ;;  %1118 = vmatpush.bf16.msra.mxu3 %v1411_v40 }
  0x89   : > { %1093 = vmatpush.bf16.msrb.mxu0 %v1547_v41 }
  0x8a   : > { %1128 = vmatpush.bf16.msrb.mxu1 %v1631_v44 }
  0x8b   : > { %1145 = vmatpush.bf16.msrb.mxu2 %v1711_v45  ;;  %1119 = vmatpush.bf16.msra.mxu3 %v1391_v48 }
  0x8c   : > { %1094 = vmatmul.bf16.vlgmr.msrb.gmra.mxu0 %v2404_v59 }
  0x8e   : > { %1129 = vmatpush.bf16.msrb.mxu1 %v1611_v49  ;;  %1120 = vmatmul.bf16.vlgmr.msra.gmra.mxu3 %v2402_v58 }
  0x8f   : > { %1776 = vmatmul.msk.bf16.vlgmr.msrb.gmra.mxu2 %vm952_vm0, %v2379_v25 }
  0x92   : > { %1130 = vmatpush.bf16.msrb.mxu1 %v1591_v52 }
  0x96   : > { %1131 = vmatpush.bf16.msrb.mxu1 %v1571_v55 }
  0x9a   : > { %1132 = vmatpush.bf16.msrb.mxu1 %v1551_v60 }
  0x9d   : > { %1133 = vmatmul.bf16.vlgmr.msrb.gmra.mxu1 %v2404_v59 }
  0xc4   : > { %v991_v61 = vpop.f32.mrf.mxu2 }
  0xc9   : > { %v965_v58 = vpop.f32.mrf.mxu0 }
  0xca   : > { %v978_v63 = vpop.f32.mrf.mxu1 }
  0xcb   : > { %v979_v0 = vadd.f32 %v978_v63, %v965_v58 }
  0xcc   : > { %v993_v3 = vpop.f32.mrf.mxu2 }
  0xcd   : > { %v992_v25 = vadd.f32 %v991_v61, %v979_v0 }
  0xcf   : > { %v1181_v2 = vadd.f32 %v1171_v1, %v992_v25  ;;  %v1175_v1 = vperm.slane %v2545_v62, 4 }
  0xd1   : > { %v1186_v4 = vsub.f32 0.0, %v1181_v2  ;;  %v1004_v5 = vpop.f32.mrf.mxu3  ;;  %v967_v6 = vpop.f32.mrf.mxu0 }
  0xd2   : > { %v980_v7 = vpop.f32.mrf.mxu1 }
  0xd3   : > { %v1191_v8 = vmul.f32 1.442695, %v1186_v4 }
  0xd5   : > { %1968 = vpow2.f32 %v1191_v8 }
  0xd9   : > { %v1006_v59 = vpop.f32.mrf.mxu3  ;;  %v1030_v9 = vpop.f32.mrf.mxu0 }
  0xdb   : > { %v1969_v10 = vpop.eup %1968 }
  0xdc   : > { %v1201_v11 = vadd.f32 1.0, %v1969_v10 }
  0xde   : > { %1970 = vrcp.f32 %v1201_v11 }
  0xe1   : > { %v1017_v12 = vpop.f32.mrf.mxu2  ;;  %v1032_v17 = vpop.f32.mrf.mxu0 }
  0xe2   : > { %v1018_v13 = vadd.f32 %v1017_v12, %v1004_v5 }
  0xe4   : > { %v1031_v15 = vadd.f32 %v1030_v9, %v1018_v13  ;;  %v1971_v18 = vpop.eup %1970 }
  0xe5   : > { %v1211_v20 = vmul.f32 %v1971_v18, %v1181_v2 }
  0xe6   : > { %v1182_v16 = vadd.f32 %v1172_v14, %v1031_v15 }
  0xe7   : > { %1216 = vst [vmem:[%s2550_s27] sm:$0xff] %v1211_v20 }
  0xe8   : > { %v1187_v19 = vsub.f32 0.0, %v1182_v16 }
  0xe9   : > { %v1019_v21 = vpop.f32.mrf.mxu2  ;;  %v1069_v24 = vpop.f32.mrf.mxu0 }
  0xea   : > { %v1193_v22 = vmul.f32 1.442695, %v1187_v19  ;;  %v1043_v23 = vpop.f32.mrf.mxu1 }
  0xec   : > { %1972 = vpow2.f32 %v1193_v22 }
  0xf1   : > { %v1056_v27 = vpop.f32.mrf.mxu3  ;;  %v1071_v34 = vpop.f32.mrf.mxu0 }
  0xf2   : > { %v1973_v26 = vpop.eup %1972  ;;  %v1057_v29 = vadd.f32 %v1056_v27, %v1043_v23  ;;  %v1045_v31 = vpop.f32.mrf.mxu1 }
  0xf3   : > { %v1202_v28 = vadd.f32 1.0, %v1973_v26 }
  0xf4   : > { %v1070_v32 = vadd.f32 %v1069_v24, %v1057_v29 }
  0xf5   : > { %1974 = vrcp.f32 %v1202_v28 }
  0xf6   : > { %v1183_v33 = vadd.f32 %v1173_v30, %v1070_v32 }
  0xf8   : > { %v1188_v35 = vsub.f32 0.0, %v1183_v33 }
  0xf9   : > { %v1058_v36 = vpop.f32.mrf.mxu3 }
  0xfa   : > { %v1195_v38 = vmul.f32 1.442695, %v1188_v35  ;;  %v1108_v40 = vpop.f32.mrf.mxu1 }
  0xfb   : > { %v1975_v37 = vpop.eup %1974 }
  0xfc   : > { %v1212_v39 = vmul.f32 %v1975_v37, %v1182_v16  ;;  %1976 = vpow2.f32 %v1195_v38 }
  0xfe   : > { %1217 = vst [vmem:[%s2550_s27 + $0x8] sm:$0xff] %v1212_v39 }
 0x101   : > { %v1082_v41 = vpop.f32.mrf.mxu2 }
 0x102   : > { %v1977_v42 = vpop.eup %1976  ;;  %v1110_v44 = vpop.f32.mrf.mxu1 }
 0x103   : > { %v1203_v43 = vadd.f32 1.0, %v1977_v42 }
 0x105   : > { %1978 = vrcp.f32 %v1203_v43 }
 0x109   : > { %v1095_v45 = vpop.f32.mrf.mxu0  ;;  %v1084_v48 = vpop.f32.mrf.mxu2 }
 0x10a   : > { %v1096_v46 = vadd.f32 %v1095_v45, %v1082_v41 }
 0x10b   : > { %v1979_v51 = vpop.eup %1978 }
 0x10c   : > { %v1109_v49 = vadd.f32 %v1108_v40, %v1096_v46  ;;  %v1213_v52 = vmul.f32 %v1979_v51, %v1183_v33 }
 0x10e   : > { %v1184_v50 = vadd.f32 %v1174_v47, %v1109_v49  ;;  %1218 = vst [vmem:[%s2550_s27 + $0x10] sm:$0xff] %v1213_v52 }
 0x110   : > { %v1189_v53 = vsub.f32 0.0, %v1184_v50 }
 0x111   : > { %v1097_v54 = vpop.f32.mrf.mxu0  ;;  %v1121_v56 = vpop.f32.mrf.mxu3 }
 0x112   : > { %v1197_v55 = vmul.f32 1.442695, %v1189_v53  ;;  %v1147_v57 = vpop.f32.mrf.mxu2 }
 0x114   : > { %1980 = vpow2.f32 %v1197_v55 }
 0x119   : > { %v1123_v58 = vpop.f32.mrf.mxu3 }
 0x11a   : > { %v1981_v60 = vpop.eup %1980  ;;  %v1134_v61 = vpop.f32.mrf.mxu1 }
 0x11b   : > { %v1204_v63 = vadd.f32 1.0, %v1981_v60  ;;  %v1135_v0 = vadd.f32 %v1134_v61, %v1121_v56  ;;  %v1149_v25 = vpop.f32.mrf.mxu2 }
 0x11d   : > { %1982 = vrcp.f32 %v1204_v63  ;;  %v1148_v2 = vadd.f32 %v1147_v57, %v1135_v0 }
 0x11f   : > { %v1185_v3 = vadd.f32 %v1175_v1, %v1148_v2 }
 0x121   : > { %v1190_v4 = vsub.f32 0.0, %v1185_v3 }
 0x122   : > { %v1136_v5 = vpop.f32.mrf.mxu1 }
 0x123   : > { %v1983_v6 = vpop.eup %1982  ;;  %v1199_v7 = vmul.f32 1.442695, %v1190_v4 }
 0x124   : > { %v1214_v8 = vmul.f32 %v1983_v6, %v1184_v50 }
 0x125   : > { %1984 = vpow2.f32 %v1199_v7 }
 0x126   : > { %1219 = vst [vmem:[%s2550_s27 + $0x18] sm:$0xff] %v1214_v8 }
 0x12b   : > { %v1985_v59 = vpop.eup %1984 }
 0x12c   : > { %v1205_v9 = vadd.f32 1.0, %v1985_v59 }
 0x12e   : > { %1986 = vrcp.f32 %v1205_v9 }
 0x134   : > { %v1987_v62 = vpop.eup %1986 }
 0x135   : > { %v1215_v10 = vmul.f32 %v1987_v62, %v1185_v3 }
 0x137   : > { %1220 = vst [vmem:[%s2550_s27 + $0x20] sm:$0xff] %v1215_v10 }
 0x138   : > { %2105 = shalt.err (!%p2102_p13)
}
 0x139   : > { %1895 = dma.vmem_to_hbm [thread:$0]  (%p2272_p0), %s1238_s9, 640, %s1240_s11, %s1222_s23  }
 0x13a PF: > { %s1251_s28 = sand.u32 1, %s2144_s12   ;;  %p1909_p4 = pnand %p1368_p3, %p2276_p2 }
 0x13b   : > { %s1252_s10 = scalar_lea.sflag [#allocation5], %s1251_s28 }
 0x13c   : > { %p1910_p5 = pneg %p1909_p4 }
 0x13e   : > { %2139 = dma.done.wait (%p1910_p5), %s1252_s10, 640  }
 0x13f   : > { %2141 = vsyncadd (%p1910_p5), %s1252_s10, 4294966656  ;;  %s20_s17 = sadd.s32 1, %s2164_s17   ;;  %s2608_s12 = smov %s2148_s13 }
 0x140   : > { %p17_p1 = scmp.ge.s32.totalorder %s20_s17, 4   ;;  %s2609_s13 = smov %s2152_s14 }
 0x141   : > { %s2610_s14 = smov %s2238_s24  ;;  %s2611_s15 = smov %s2160_s16 }
 0x142   : > { %s2612_s16 = smov %s2614_s18  ;;  %19 = sbr.rel (!%p17_p1) target bundleno = 7 (0x7), region = 102 }
 0x147   :  { %1258 = vsyncpa [#allocation4], 1 }
 0x148   :  { %1260 = vsyncpa [#allocation4 + $0x1], 1 }
 0x149   :  { %1261 = vsyncpa [#allocation7], 1 }
 0x14a   :  { %1263 = vsyncpa [#allocation7 + $0x1], 1 }
 0x14b   :  { %1264 = vsyncpa [#allocation5], 1 }
 0x14c   :  { %1266 = vsyncpa [#allocation5 + $0x1], 1 }

</bundles_post_ra>
